<compile_context>
chip_gen: v7x
topology: tpu7x:2x2x1
jax: 0.10.0
libtpu: 0.0.40
codegen_flags: <defaults>
</compile_context>

<pallas_src>
import functools

import jax
import jax.numpy as jnp
from jax.experimental import pallas as pl
from jax.experimental.pallas import tpu as pltpu

EPS = 1e-5  # BatchNorm1d default eps


# --------------------------------------------------------------------------
# Pallas kernel: whole forward pass on one resident tile (problem is tiny).
# --------------------------------------------------------------------------
def inception_kernel(xe_ref, xo_ref, wf_ref, ws_ref, aux_ref, out_ref, *,
                     lout, l_in, c0, c1, c2, c3, c4, c5):
    f32 = jnp.float32
    n, cin = xe_ref.shape[0], xe_ref.shape[1]
    c_first = c0 + c1 + c3            # fused layer-1 output channels
    c_second = c2 + c4 + c5           # fused layer-2 output channels
    nbn = c2 + c4                     # channels that get BatchNorm

    xe = xe_ref[...]                  # (N, Cin, Lout+2) even phase of padded x
    xo = xo_ref[...]                  # (N, Cin, Lout+2) odd  phase
    aux = aux_ref[...]                # (Cmax, 4) f32: bias1 | bias2 | gamma | beta
    cdt = xe.dtype                    # matmul operand dtype (bf16 or f32)

    # ---- five k5/stride-2 taps from shifted slices: tap t == xpad2[2l + t] ----
    t0 = xe[:, :, 0:lout]
    t1 = xo[:, :, 0:lout]
    t2 = xe[:, :, 1:lout + 1]
    t3 = xo[:, :, 1:lout + 1]
    t4 = xe[:, :, 2:lout + 2]

    # ---- layer 1: conv1x1 + conv3 + conv5 (all stride 2) as ONE matmul ----
    patches = jnp.concatenate([t0, t1, t2, t3, t4], axis=1)       # (N, 5Cin, Lout)
    wf = jnp.broadcast_to(wf_ref[...], (n,) + tuple(wf_ref.shape))
    h_first = jnp.einsum("nck,nkl->ncl", wf, patches,
                         preferred_element_type=f32)
    h_first = jnp.maximum(h_first + aux[:c_first, 0:1][None], 0.0)
    y0 = h_first[:, :c0, :]            # branch-0 output: relu(conv1x1)
    h1 = h_first[:, c0:c0 + c1, :]     # branch-1 hidden
    h2 = h_first[:, c0 + c1:, :]       # branch-2 hidden

    # ---- branch-3 maxpool(k3, s2, p1): taps 1..3, -inf at the edges ----
    l_idx = jax.lax.broadcasted_iota(jnp.int32, (n, cin, lout), 2)
    neg_inf = jnp.float32(-jnp.inf)    # pool pads with -inf, conv pads with 0
    p1 = jnp.where(l_idx >= 1, t1.astype(f32), neg_inf)             # x[2l-1]
    p3 = jnp.where(2 * l_idx + 1 < l_in, t3.astype(f32), neg_inf)   # x[2l+1]
    xpool = jnp.maximum(jnp.maximum(p1, t2.astype(f32)), p3)

    # ---- layer 2: three 1x1 convs as ONE block-diagonal matmul ----
    z = jnp.concatenate([h1, h2, xpool], axis=1).astype(cdt)  # (N, c1+c3+Cin, L)
    ws = jnp.broadcast_to(ws_ref[...], (n,) + tuple(ws_ref.shape))
    h_second = jnp.einsum("nck,nkl->ncl", ws, z,
                          preferred_element_type=f32)
    h_second = jnp.maximum(h_second + aux[:c_second, 1:2][None], 0.0)

    # ---- training-mode BatchNorm on the (c2 | c4) channels (static split) ----
    hb = h_second[:, :nbn, :]
    cnt = jnp.float32(n * lout)
    m = jnp.sum(jnp.sum(hb, axis=2, keepdims=True), axis=0, keepdims=True) / cnt
    ex2 = jnp.sum(jnp.sum(hb * hb, axis=2, keepdims=True),
                  axis=0, keepdims=True) / cnt
    inv = jax.lax.rsqrt(ex2 - m * m + EPS)                    # one-pass biased var
    bn = (hb - m) * inv * aux[:nbn, 2:3][None] + aux[:nbn, 3:4][None]

    # ---- NCL output via three sublane sub-stores (no output concat) ----
    out_ref[:, 0:c0, :] = y0
    out_ref[:, c0:c0 + nbn, :] = bn
    out_ref[:, c0 + nbn:, :] = h_second[:, nbn:, :]


# --------------------------------------------------------------------------
# Parameter packing -- call ONCE outside the per-step forward (hoisted).
# --------------------------------------------------------------------------
def pack_inception_params(params, matmul_dtype=jnp.bfloat16):
    c0, cin, _ = params["w0"].shape
    c1 = params["w1a"].shape[0]
    c2 = params["w1b"].shape[0]
    c3 = params["w2a"].shape[0]
    c4 = params["w2b"].shape[0]
    c5 = params["w3b"].shape[0]
    c_first, c_second = c0 + c1 + c3, c2 + c4 + c5
    c_max = max(c_first, c_second)

    # fused layer-1 weight W^T: rows = out channel (c0|c1|c3), cols = (tap, ci)
    wf = jnp.zeros((c_first, 5 * cin), jnp.float32)
    wf = wf.at[:c0, 2 * cin:3 * cin].set(params["w0"][:, :, 0])
    for j in range(3):
        wf = wf.at[c0:c0 + c1, (1 + j) * cin:(2 + j) * cin].set(params["w1a"][:, :, j])
    for j in range(5):
        wf = wf.at[c0 + c1:, j * cin:(j + 1) * cin].set(params["w2a"][:, :, j])

    # fused layer-2 weight: block diagonal over (h1 | h2 | pooled x)
    ws = jnp.zeros((c_second, c1 + c3 + cin), jnp.float32)
    ws = ws.at[:c2, :c1].set(params["w1b"][:, :, 0])
    ws = ws.at[c2:c2 + c4, c1:c1 + c3].set(params["w2b"][:, :, 0])
    ws = ws.at[c2 + c4:, c1 + c3:].set(params["w3b"][:, :, 0])

    def col(v):
        v = v.astype(jnp.float32)
        return jnp.pad(v, (0, c_max - v.shape[0]))

    aux = jnp.stack([
        col(jnp.concatenate([params["b0"], params["b1a"], params["b2a"]])),
        col(jnp.concatenate([params["b1b"], params["b2b"], params["b3b"]])),
        col(jnp.concatenate([params["g1"], params["g2"]])),
        col(jnp.concatenate([params["be1"], params["be2"]])),
    ], axis=1)                                            # (Cmax, 4) f32

    return wf.astype(matmul_dtype), ws.astype(matmul_dtype), aux


# --------------------------------------------------------------------------
# JAX wrapper: pad + even/odd phase split (~1x bytes), one pallas_call.
# --------------------------------------------------------------------------
def inception1d_forward(x, wf_t, ws_t, aux, *, dims):
    c0, c1, c2, c3, c4, c5 = dims
    N, Cin, L = x.shape
    lout = (L - 1) // 2 + 1
    c_tot = c0 + c2 + c4 + c5

    # conv zero-pad (2 left, to total length 2*lout+4) + stride-2 phase split;
    # tap t of the k5 window is a shifted slice of one of these phases.
    xp = jnp.pad(x, ((0, 0), (0, 0), (2, 2 * lout + 2 - L)))
    cdt = wf_t.dtype
    xe = xp[:, :, 0::2].astype(cdt)                        # (N, Cin, lout+2)
    xo = xp[:, :, 1::2].astype(cdt)

    kernel = functools.partial(
        inception_kernel, lout=lout, l_in=L,
        c0=c0, c1=c1, c2=c2, c3=c3, c4=c4, c5=c5)

    vmem = pl.BlockSpec(memory_space=pltpu.MemorySpace.VMEM)
    # TODO(synk): for large N*Lout add a row grid (dimension_semantics=
    # ("parallel",)) so v7x's second TensorCore is used, with BN batch stats
    # split into an accumulate + apply phase, and size the row tile for v7x's
    # 64 MiB VMEM via pltpu.CompilerParams(vmem_limit_bytes=...). Whole-batch
    # BN statistics forbid naive row tiling, so the demo stays single-block.
    return pl.pallas_call(
        kernel,
        out_shape=jax.ShapeDtypeStruct((N, c_tot, lout), jnp.float32),
        in_specs=[vmem] * 5,
        out_specs=vmem,
    )(xe, xo, wf_t, ws_t, aux)          # output already in PyTorch NCL order


# --------------------------------------------------------------------------
# Pure-JAX references (mirror PyTorch forward in training mode).
# --------------------------------------------------------------------------
def _conv1d_ref(x, w, b, stride, pad):
    y = jax.lax.conv_general_dilated(
        x, w, window_strides=(stride,), padding=[(pad, pad)],
        dimension_numbers=("NCH", "OIH", "NCH"))
    return y + b[None, :, None]


def _bn_train_ref(x, g, be):
    m = jnp.mean(x, axis=(0, 2), keepdims=True)
    v = jnp.mean((x - m) ** 2, axis=(0, 2), keepdims=True)
    return (x - m) * jax.lax.rsqrt(v + EPS) * g[None, :, None] + be[None, :, None]


def inception1d_reference(x, p):
    relu = lambda v: jnp.maximum(v, 0.0)
    b0 = relu(_conv1d_ref(x, p["w0"], p["b0"], 2, 0))
    b1 = _bn_train_ref(relu(_conv1d_ref(relu(_conv1d_ref(x, p["w1a"], p["b1a"], 2, 1)),
                                        p["w1b"], p["b1b"], 1, 0)),
                       p["g1"], p["be1"])
    b2 = _bn_train_ref(relu(_conv1d_ref(relu(_conv1d_ref(x, p["w2a"], p["b2a"], 2, 2)),
                                        p["w2b"], p["b2b"], 1, 0)),
                       p["g2"], p["be2"])
    pooled = jax.lax.reduce_window(
        x, -jnp.inf, jax.lax.max, (1, 1, 3), (1, 1, 2),
        [(0, 0), (0, 0), (1, 1)])
    b3 = relu(_conv1d_ref(pooled, p["w3b"], p["b3b"], 1, 0))
    return jnp.concatenate([b0, b1, b2, b3], axis=1)


def inception1d_reference_mixed(x, p, dtype=jnp.bfloat16):
    """Same forward, with the kernel's mixed-precision policy: conv operands
    (x, conv weights, hidden activations) quantized to `dtype`, accumulation /
    bias / pool / BN math in f32."""
    q = lambda a: a.astype(dtype).astype(jnp.float32)
    relu = lambda v: jnp.maximum(v, 0.0)
    xq = q(x)
    b0 = relu(_conv1d_ref(xq, q(p["w0"]), p["b0"], 2, 0))
    h1 = q(relu(_conv1d_ref(xq, q(p["w1a"]), p["b1a"], 2, 1)))
    b1 = _bn_train_ref(relu(_conv1d_ref(h1, q(p["w1b"]), p["b1b"], 1, 0)),
                       p["g1"], p["be1"])
    h2 = q(relu(_conv1d_ref(xq, q(p["w2a"]), p["b2a"], 2, 2)))
    b2 = _bn_train_ref(relu(_conv1d_ref(h2, q(p["w2b"]), p["b2b"], 1, 0)),
                       p["g2"], p["be2"])
    pooled = q(jax.lax.reduce_window(
        xq, -jnp.inf, jax.lax.max, (1, 1, 3), (1, 1, 2),
        [(0, 0), (0, 0), (1, 1)]))
    b3 = relu(_conv1d_ref(pooled, q(p["w3b"]), p["b3b"], 1, 0))
    return jnp.concatenate([b0, b1, b2, b3], axis=1)


# --------------------------------------------------------------------------
def make_params(key, in_channels, out_channels):
    ks = jax.random.split(key, 16)
    n = functools.partial(jax.random.normal, dtype=jnp.float32)
    c0, c1, c2, c3, c4, c5 = out_channels
    return {
        "w0":  0.1 * n(ks[0],  (c0, in_channels, 1)), "b0":  0.1 * n(ks[1],  (c0,)),
        "w1a": 0.1 * n(ks[2],  (c1, in_channels, 3)), "b1a": 0.1 * n(ks[3],  (c1,)),
        "w1b": 0.1 * n(ks[4],  (c2, c1, 1)),          "b1b": 0.1 * n(ks[5],  (c2,)),
        "g1":  1.0 + 0.1 * n(ks[6], (c2,)),           "be1": 0.1 * n(ks[7],  (c2,)),
        "w2a": 0.1 * n(ks[8],  (c3, in_channels, 5)), "b2a": 0.1 * n(ks[9],  (c3,)),
        "w2b": 0.1 * n(ks[10], (c4, c3, 1)),          "b2b": 0.1 * n(ks[11], (c4,)),
        "g2":  1.0 + 0.1 * n(ks[12], (c4,)),          "be2": 0.1 * n(ks[13], (c4,)),
        "w3b": 0.1 * n(ks[14], (c5, in_channels, 1)), "b3b": 0.1 * n(ks[15], (c5,)),
    }


if __name__ == "__main__":
    key = jax.random.PRNGKey(0)
    kx, kp = jax.random.split(key)

    N, Cin, L = 2, 4, 16
    out_channels = (4, 6, 8, 6, 8, 4)   # concat channels = 4 + 8 + 8 + 4 = 24
    lout = (L - 1) // 2 + 1

    x = jax.random.normal(kx, (N, Cin, L), dtype=jnp.float32)
    params = make_params(kp, Cin, out_channels)

    fwd = jax.jit(functools.partial(inception1d_forward, dims=out_channels))

    # 1) exact-semantics check: f32 matmul operands vs. the pure-JAX reference.
    packed_f32 = pack_inception_params(params, matmul_dtype=jnp.float32)
    y32 = jax.block_until_ready(fwd(x, *packed_f32))
    y_ref = inception1d_reference(x, params)
    assert y32.shape == y_ref.shape == (N, 24, lout)
    assert jnp.allclose(y32, y_ref, atol=1e-3, rtol=1e-3)

    # 2) production path: bf16 matmul operands (f32 accumulation/elementwise),
    #    validated against a reference using the same mixed-precision policy.
    packed_bf16 = pack_inception_params(params)             # bf16 by default
    y16 = jax.block_until_ready(fwd(x, *packed_bf16))
    y_ref16 = inception1d_reference_mixed(x, params)
    assert y16.shape == (N, 24, lout)
    assert bool(jnp.all(jnp.isfinite(y16)))
    assert jnp.allclose(y16, y_ref16, atol=5e-2, rtol=5e-2)

    print("KERNEL_OK")
</pallas_src>

<mosaic_0001>
module attributes {stable_mosaic.version = 11 : i64} {
  func.func @inception_kernel(%arg0: memref<2x4x10xf32, #tpu.memory_space<vmem>>, %arg1: memref<2x4x10xf32, #tpu.memory_space<vmem>>, %arg2: memref<16x20xf32, #tpu.memory_space<vmem>>, %arg3: memref<20x16xf32, #tpu.memory_space<vmem>>, %arg4: memref<20x4xf32, #tpu.memory_space<vmem>>, %arg5: memref<2x24x8xf32, #tpu.memory_space<vmem>>) attributes {dimension_semantics = [], scalar_prefetch = 0 : i64, scratch_operands = 0 : i64, tpu.core_type = #tpu.core_type<tc>} {
    %c0 = arith.constant 0 : index
    %c0_0 = arith.constant 0 : index
    %c0_1 = arith.constant 0 : index
    %0 = vector.load %arg0[%c0, %c0_0, %c0_1] : memref<2x4x10xf32, #tpu.memory_space<vmem>>, vector<2x4x10xf32>
    %c0_2 = arith.constant 0 : index
    %c0_3 = arith.constant 0 : index
    %c0_4 = arith.constant 0 : index
    %1 = vector.load %arg1[%c0_2, %c0_3, %c0_4] : memref<2x4x10xf32, #tpu.memory_space<vmem>>, vector<2x4x10xf32>
    %c0_5 = arith.constant 0 : index
    %c0_6 = arith.constant 0 : index
    %2 = vector.load %arg4[%c0_5, %c0_6] : memref<20x4xf32, #tpu.memory_space<vmem>>, vector<20x4xf32>
    %3 = vector.extract_strided_slice %0 {offsets = [0, 0, 0], sizes = [2, 4, 8], strides = [1, 1, 1]} : vector<2x4x10xf32> to vector<2x4x8xf32>
    %4 = vector.extract_strided_slice %1 {offsets = [0, 0, 0], sizes = [2, 4, 8], strides = [1, 1, 1]} : vector<2x4x10xf32> to vector<2x4x8xf32>
    %5 = vector.extract_strided_slice %0 {offsets = [0, 0, 1], sizes = [2, 4, 8], strides = [1, 1, 1]} : vector<2x4x10xf32> to vector<2x4x8xf32>
    %6 = vector.extract_strided_slice %1 {offsets = [0, 0, 1], sizes = [2, 4, 8], strides = [1, 1, 1]} : vector<2x4x10xf32> to vector<2x4x8xf32>
    %7 = vector.extract_strided_slice %0 {offsets = [0, 0, 2], sizes = [2, 4, 8], strides = [1, 1, 1]} : vector<2x4x10xf32> to vector<2x4x8xf32>
    %8 = tpu.concatenate %3, %4, %5, %6, %7 in 1 : vector<2x4x8xf32>, vector<2x4x8xf32>, vector<2x4x8xf32>, vector<2x4x8xf32>, vector<2x4x8xf32> -> vector<2x20x8xf32>
    %c0_7 = arith.constant 0 : index
    %c0_8 = arith.constant 0 : index
    %9 = vector.load %arg2[%c0_7, %c0_8] : memref<16x20xf32, #tpu.memory_space<vmem>>, vector<16x20xf32>
    %10 = vector.shape_cast %9 : vector<16x20xf32> to vector<1x16x20xf32>
    %11 = vector.broadcast %10 : vector<1x16x20xf32> to vector<2x16x20xf32>
    "tpu.trace_start"() <{level = 10 : i32, message = "nck,nkl->ncl"}> : () -> ()
    %cst = arith.constant dense<0.000000e+00> : vector<2x16x8xf32>
    %12 = tpu.matmul %11, %8, %cst {dimension_numbers = #tpu.dot_dimension_numbers<[2], [1], [1], [2], [0, 0, 0, 1, 1, 2], [0], [0]>} : vector<2x16x20xf32>, vector<2x20x8xf32>, vector<2x16x8xf32> -> vector<2x16x8xf32>
    "tpu.trace_stop"() : () -> ()
    %13 = vector.extract_strided_slice %2 {offsets = [0, 0], sizes = [16, 1], strides = [1, 1]} : vector<20x4xf32> to vector<16x1xf32>
    %14 = vector.shape_cast %13 : vector<16x1xf32> to vector<1x16x1xf32>
    %15 = vector.broadcast %14 : vector<1x16x1xf32> to vector<2x16x8xf32>
    %16 = arith.addf %12, %15 : vector<2x16x8xf32>
    %cst_9 = arith.constant 0.000000e+00 : f32
    %17 = vector.broadcast %cst_9 : f32 to vector<2x16x8xf32>
    %18 = arith.maximumf %16, %17 : vector<2x16x8xf32>
    %19 = vector.extract_strided_slice %18 {offsets = [0, 0, 0], sizes = [2, 4, 8], strides = [1, 1, 1]} : vector<2x16x8xf32> to vector<2x4x8xf32>
    %20 = vector.extract_strided_slice %18 {offsets = [0, 4, 0], sizes = [2, 6, 8], strides = [1, 1, 1]} : vector<2x16x8xf32> to vector<2x6x8xf32>
    %21 = vector.extract_strided_slice %18 {offsets = [0, 10, 0], sizes = [2, 6, 8], strides = [1, 1, 1]} : vector<2x16x8xf32> to vector<2x6x8xf32>
    %22 = tpu.iota {dimensions = array<i32: 2>} : vector<2x4x8xi32>
    %c1_i32 = arith.constant 1 : i32
    %23 = vector.broadcast %c1_i32 : i32 to vector<2x4x8xi32>
    %24 = arith.cmpi sge, %22, %23 : vector<2x4x8xi32>
    %cst_10 = arith.constant 0xFF800000 : f32
    %25 = vector.broadcast %cst_10 : f32 to vector<2x4x8xf32>
    %26 = arith.select %24, %4, %25 : vector<2x4x8xi1>, vector<2x4x8xf32>
    %c2_i32 = arith.constant 2 : i32
    %27 = vector.broadcast %c2_i32 : i32 to vector<2x4x8xi32>
    %28 = arith.muli %27, %22 : vector<2x4x8xi32>
    %c1_i32_11 = arith.constant 1 : i32
    %29 = vector.broadcast %c1_i32_11 : i32 to vector<2x4x8xi32>
    %30 = arith.addi %28, %29 : vector<2x4x8xi32>
    %c16_i32 = arith.constant 16 : i32
    %31 = vector.broadcast %c16_i32 : i32 to vector<2x4x8xi32>
    %32 = arith.cmpi slt, %30, %31 : vector<2x4x8xi32>
    %cst_12 = arith.constant 0xFF800000 : f32
    %33 = vector.broadcast %cst_12 : f32 to vector<2x4x8xf32>
    %34 = arith.select %32, %6, %33 : vector<2x4x8xi1>, vector<2x4x8xf32>
    %35 = arith.maximumf %26, %5 : vector<2x4x8xf32>
    %36 = arith.maximumf %35, %34 : vector<2x4x8xf32>
    %37 = tpu.concatenate %20, %21, %36 in 1 : vector<2x6x8xf32>, vector<2x6x8xf32>, vector<2x4x8xf32> -> vector<2x16x8xf32>
    %c0_13 = arith.constant 0 : index
    %c0_14 = arith.constant 0 : index
    %38 = vector.load %arg3[%c0_13, %c0_14] : memref<20x16xf32, #tpu.memory_space<vmem>>, vector<20x16xf32>
    %39 = vector.shape_cast %38 : vector<20x16xf32> to vector<1x20x16xf32>
    %40 = vector.broadcast %39 : vector<1x20x16xf32> to vector<2x20x16xf32>
    "tpu.trace_start"() <{level = 10 : i32, message = "nck,nkl->ncl"}> : () -> ()
    %cst_15 = arith.constant dense<0.000000e+00> : vector<2x20x8xf32>
    %41 = tpu.matmul %40, %37, %cst_15 {dimension_numbers = #tpu.dot_dimension_numbers<[2], [1], [1], [2], [0, 0, 0, 1, 1, 2], [0], [0]>} : vector<2x20x16xf32>, vector<2x16x8xf32>, vector<2x20x8xf32> -> vector<2x20x8xf32>
    "tpu.trace_stop"() : () -> ()
    %42 = vector.extract_strided_slice %2 {offsets = [0, 1], sizes = [20, 1], strides = [1, 1]} : vector<20x4xf32> to vector<20x1xf32>
    %43 = vector.shape_cast %42 : vector<20x1xf32> to vector<1x20x1xf32>
    %44 = vector.broadcast %43 : vector<1x20x1xf32> to vector<2x20x8xf32>
    %45 = arith.addf %41, %44 : vector<2x20x8xf32>
    %cst_16 = arith.constant 0.000000e+00 : f32
    %46 = vector.broadcast %cst_16 : f32 to vector<2x20x8xf32>
    %47 = arith.maximumf %45, %46 : vector<2x20x8xf32>
    %48 = vector.extract_strided_slice %47 {offsets = [0, 0, 0], sizes = [2, 16, 8], strides = [1, 1, 1]} : vector<2x20x8xf32> to vector<2x16x8xf32>
    %cst_17 = arith.constant dense<0.000000e+00> : vector<2x16xf32>
    %49 = vector.multi_reduction <add>, %48, %cst_17 [2] : vector<2x16x8xf32> to vector<2x16xf32>
    %50 = vector.shape_cast %49 : vector<2x16xf32> to vector<2x16x1xf32>
    %cst_18 = arith.constant dense<0.000000e+00> : vector<16x1xf32>
    %51 = vector.multi_reduction <add>, %50, %cst_18 [0] : vector<2x16x1xf32> to vector<16x1xf32>
    %52 = vector.shape_cast %51 : vector<16x1xf32> to vector<1x16x1xf32>
    %cst_19 = arith.constant 1.600000e+01 : f32
    %53 = vector.broadcast %cst_19 : f32 to vector<1x16x1xf32>
    %54 = arith.divf %52, %53 : vector<1x16x1xf32>
    %55 = arith.mulf %48, %48 : vector<2x16x8xf32>
    %cst_20 = arith.constant dense<0.000000e+00> : vector<2x16xf32>
    %56 = vector.multi_reduction <add>, %55, %cst_20 [2] : vector<2x16x8xf32> to vector<2x16xf32>
    %57 = vector.shape_cast %56 : vector<2x16xf32> to vector<2x16x1xf32>
    %cst_21 = arith.constant dense<0.000000e+00> : vector<16x1xf32>
    %58 = vector.multi_reduction <add>, %57, %cst_21 [0] : vector<2x16x1xf32> to vector<16x1xf32>
    %59 = vector.shape_cast %58 : vector<16x1xf32> to vector<1x16x1xf32>
    %cst_22 = arith.constant 1.600000e+01 : f32
    %60 = vector.broadcast %cst_22 : f32 to vector<1x16x1xf32>
    %61 = arith.divf %59, %60 : vector<1x16x1xf32>
    %62 = arith.mulf %54, %54 : vector<1x16x1xf32>
    %63 = arith.subf %61, %62 : vector<1x16x1xf32>
    %cst_23 = arith.constant 9.99999974E-6 : f32
    %64 = vector.broadcast %cst_23 : f32 to vector<1x16x1xf32>
    %65 = arith.addf %63, %64 : vector<1x16x1xf32>
    %66 = math.rsqrt %65 : vector<1x16x1xf32>
    %67 = vector.broadcast %54 : vector<1x16x1xf32> to vector<2x16x8xf32>
    %68 = arith.subf %48, %67 : vector<2x16x8xf32>
    %69 = vector.broadcast %66 : vector<1x16x1xf32> to vector<2x16x8xf32>
    %70 = arith.mulf %68, %69 : vector<2x16x8xf32>
    %71 = vector.extract_strided_slice %2 {offsets = [0, 2], sizes = [16, 1], strides = [1, 1]} : vector<20x4xf32> to vector<16x1xf32>
    %72 = vector.shape_cast %71 : vector<16x1xf32> to vector<1x16x1xf32>
    %73 = vector.broadcast %72 : vector<1x16x1xf32> to vector<2x16x8xf32>
    %74 = arith.mulf %70, %73 : vector<2x16x8xf32>
    %75 = vector.extract_strided_slice %2 {offsets = [0, 3], sizes = [16, 1], strides = [1, 1]} : vector<20x4xf32> to vector<16x1xf32>
    %76 = vector.shape_cast %75 : vector<16x1xf32> to vector<1x16x1xf32>
    %77 = vector.broadcast %76 : vector<1x16x1xf32> to vector<2x16x8xf32>
    %78 = arith.addf %74, %77 : vector<2x16x8xf32>
    %c0_24 = arith.constant 0 : index
    %c0_25 = arith.constant 0 : index
    %c0_26 = arith.constant 0 : index
    %79 = vector.load %arg5[%c0_24, %c0_25, %c0_26] : memref<2x24x8xf32, #tpu.memory_space<vmem>>, vector<2x4x8xf32>
    tpu.vector_store %arg5[%c0_24, %c0_25, %c0_26], %19 {strides = array<i32>} : memref<2x24x8xf32, #tpu.memory_space<vmem>>, vector<2x4x8xf32>,
    %c0_27 = arith.constant 0 : index
    %c4 = arith.constant 4 : index
    %c0_28 = arith.constant 0 : index
    %80 = vector.load %arg5[%c0_27, %c4, %c0_28] : memref<2x24x8xf32, #tpu.memory_space<vmem>>, vector<2x16x8xf32>
    tpu.vector_store %arg5[%c0_27, %c4, %c0_28], %78 {strides = array<i32>} : memref<2x24x8xf32, #tpu.memory_space<vmem>>, vector<2x16x8xf32>,
    %81 = vector.extract_strided_slice %47 {offsets = [0, 16, 0], sizes = [2, 4, 8], strides = [1, 1, 1]} : vector<2x20x8xf32> to vector<2x4x8xf32>
    %c0_29 = arith.constant 0 : index
    %c20 = arith.constant 20 : index
    %c0_30 = arith.constant 0 : index
    %82 = vector.load %arg5[%c0_29, %c20, %c0_30] : memref<2x24x8xf32, #tpu.memory_space<vmem>>, vector<2x4x8xf32>
    tpu.vector_store %arg5[%c0_29, %c20, %c0_30], %81 {strides = array<i32>} : memref<2x24x8xf32, #tpu.memory_space<vmem>>, vector<2x4x8xf32>,
    return
  }
}

</mosaic_0001>

<bundles_post_ra>
// kernel: inception1d_forward.1
= control target key start
LH: loop header
LB: loop body
LE: loop exit
PB: predicated region body
PF: predicated region fallthrough
CT: control target
= control target key end

     0   :  { %vm51_vm0 = vcmask 1043456   ;;  %v686_v3 = vmov 0   ;;  %s687_s24 = smov 126   ;;  %s688_s27 = smov 127   ;;  %vm68_vm1 = vcmask 162816   ;;  %v233_v15 = vlaneseq  ;;  %s859_s0 = inlined_call_operand.vmem [shape: f32[2,4,10], index: 0, kind: input, shape index: {}]   ;;  %s860_s1 = inlined_call_operand.vmem [shape: f32[2,4,10], index: 1, kind: input, shape index: {}]   ;;  %s861_s2 = inlined_call_operand.vmem [shape: f32[16,20], index: 2, kind: input, shape index: {}]   ;;  %s862_s4 = inlined_call_operand.vmem [shape: f32[20,4], index: 4, kind: input, shape index: {}]   ;;  %s863_s5 = inlined_call_operand.vmem [shape: f32[2,24,8], index: 5, kind: output, shape index: {}]   ;;  %s864_s3 = inlined_call_operand.vmem [shape: f32[20,16], index: 3, kind: input, shape index: {}]  }
   0x1   :  { %v20_v0 = vld [vmem:[%s859_s0] sm:$0xf]  ;;  %v21_v1 = vld [vmem:[%s859_s0 + $0x4] sm:$0xf]  ;;  %671 = vset.pattern.permute.xlu1 %v686_v3  ;;  %670 = vset.pattern.permute.xlu0 %v686_v3  ;;  %v747_v12 = vld [vmem:[%s862_s4 + $0x8] sm:$0xff]  ;;  %v689_v34 = vmov 0.0|0.0  }
   0x2   :  { %v22_v2 = vld [vmem:[%s860_s1] sm:$0xf]  ;;  %47 = vrot.lane.b32.xlu1 %v20_v0, %s687_s24  ;;  %v660_v4 = vpack.i.bf16 %v21_v1, %v20_v0  ;;  %v23_v5 = vld [vmem:[%s860_s1 + $0x4] sm:$0xf]  ;;  %v234_v16 = vand.u32 127, %v233_v15  ;;  %v57_v33 = vld [vmem:[%s861_s2 + $0x8] sm:$0xff] }
   0x3   :  { %v29_v6 = vrot.slane %v22_v2, 4  ;;  %v30_v7 = vrot.slane %v23_v5, 4  ;;  %v56_v9 = vld [vmem:[%s861_s2] sm:$0xff]  ;;  %v672_v13 = vpack.i.bf16 %v23_v5, %v22_v2  ;;  %vm690_vm3 = vmmov 0  }
   0x4   :  { %661 = vrot.lane.b32.xlu0 %v660_v4, %s688_s27  ;;  %599 = vmatprep.mubr.msk.f32.mxu0 %vm68_vm1, %v56_v9  ;;  %v753_v14 = vld [vmem:[%s862_s4] sm:$0xff]  ;;  %vm235_vm2 = vcmp.ge.s32.totalorder %v234_v16, 1  ;;  %v691_v35 = vmov 0.0   ;;  %v692_v36 = vmov 1   ;;  %v238_v38 = vmul.u32 2, %v234_v16 }
   0x5   :  { %v52_v8 = vsel %vm51_vm0, %v20_v0, %v29_v6  ;;  %v665_v10 = vpack.i.bf16 %v30_v7, %v29_v6  ;;  %v53_v11 = vsel %vm51_vm0, %v21_v1, %v30_v7  ;;  %608 = vmatprep.mubr.msk.f32.mxu1 %vm68_vm1, %v56_v9  ;;  %v236_v17 = vsel %vm235_vm2, %v22_v2, -inf }
   0x6   :  { %49 = vrot.lane.b32.xlu1 %v21_v1, %s687_s24  ;;  %v237_v18 = vsel %vm235_vm2, %v23_v5, -inf  ;;  %v239_v39 = vadd.s32 1, %v238_v38  ;;  %vm548_vm5 = vcmask 60416   ;;  %vm273_vm6 = vcmask 1045504  }
   0x7   :  { %vm294_vm7 = vcmask 130048   ;;  %v693_v15 = vmov 2   ;;  %vm470_vm8 = vcmask 64512  }
   0x8   :  { %666 = vrot.lane.b32.xlu0 %v665_v10, %s688_s27  ;;  %vm240_vm4 = vcmp.lt.s32.totalorder %v239_v39, 16  ;;  %v278_v10 = vld [vmem:[%s864_s3] sm:$0xff]  ;;  %v694_v39 = vmov 3  }
   0xa   :  { %65 = vperm.xlu1 %671, %v747_v12  }
   0xc   :  { %60 = vperm.xlu0 %670, %v753_v14  }
   0xe   :  { %673 = vrot.lane.b32.xlu1 %v672_v13, %s688_s27  ;;  %v280_v13 = vld [vmem:[%s864_s3 + $0x10] sm:$0xf] }
   0xf   :  { %678 = vset.pattern.permute.xlu1 %v692_v36 }
  0x10   :  { %677 = vset.pattern.permute.xlu0 %v692_v36 }
  0x11   :  { %282 = vperm.xlu0 %677, %v753_v14  }
  0x12   :  { %286 = vperm.xlu1 %678, %v747_v12  }
  0x16   :  { %679 = vset.pattern.permute.xlu1 %v693_v15 }
  0x74   :  { %v48_v24 = vpop.permute.xlu1 %47 }
  0x76   :  { %v662_v19 = vpop.permute.xlu0 %661 }
  0x77   :  { %v664_v20 = vunpack.i.h.bf16 %v662_v19  ;;  %v663_v21 = vunpack.i.l.bf16 %v662_v19 }
  0x78   :  { %v50_v32 = vpop.permute.xlu1 %49 }
  0x79   :  { %v250_v22 = vmax.f32 %v237_v18, %v664_v20  ;;  %v249_v23 = vmax.f32 %v236_v17, %v663_v21 }
  0x7a   :  { %v667_v25 = vpop.permute.xlu0 %666 }
  0x7b   :  { %v669_v26 = vunpack.i.h.bf16 %v667_v25  ;;  %v668_v27 = vunpack.i.l.bf16 %v667_v25 }
  0x7d   :  { %v54_v28 = vsel %vm51_vm0, %v663_v21, %v668_v27  ;;  %v55_v29 = vsel %vm51_vm0, %v664_v20, %v669_v26 }
  0x7e   :  { %v637_v30 = vpack.c.bf16 %v54_v28, %v52_v8  ;;  %v641_v31 = vpack.c.bf16 %v55_v29, %v53_v11  ;;  %v279_v11 = vld [vmem:[%s864_s3 + $0x8] sm:$0xff] }
  0x80   :  { %638 = vmatprep.subr.bf16.mxu0 %v637_v30  ;;  %642 = vmatprep.subr.bf16.mxu1 %v641_v31 }
  0x81   :  { %640 = vmatpush3.bf16.msra.mxu0 %v637_v30  ;;  %644 = vmatpush3.bf16.msra.mxu1 %v641_v31 }
  0x82   :  { %597 = vmatprep.subr.msk.mxu0 %vm51_vm0, %v48_v24  ;;  %606 = vmatprep.subr.msk.mxu1 %vm51_vm0, %v50_v32 }
  0x85   :  { %598 = vmatpush3.msk.msra.mxu0 %vm51_vm0, %v48_v24  ;;  %607 = vmatpush3.msk.msra.mxu1 %vm51_vm0, %v50_v32 }
  0x86   :  { %600 = vmatmul.mubr.msk.f32.vlgmr.msra.gmra.mrb[0].mxu0 %vm68_vm1, %v57_v33  ;;  %609 = vmatmul.mubr.msk.f32.vlgmr.msra.gmra.mrb[0].mxu1 %vm68_vm1, %v57_v33 }
  0x87   :  { %645 = vmatprep.subr.bf16.mxu0 %v689_v34  ;;  %648 = vmatprep.subr.bf16.mxu1 %v689_v34 }
  0x88   :  { %615 = vmatprep.mubr.msk.f32.mxu0 %vm690_vm3, %v691_v35  ;;  %628 = vmatprep.mubr.msk.f32.mxu1 %vm690_vm3, %v691_v35 }
  0x89   :  { %v66_v37 = vpop.permute.xlu1 %65 }
  0x8b   :  { %v61_v45 = vpop.permute.xlu0 %60 }
  0x8d   :  { %v674_v40 = vpop.permute.xlu1 %673 }
  0x8e   :  { %v676_v41 = vunpack.i.h.bf16 %v674_v40  ;;  %v675_v42 = vunpack.i.l.bf16 %v674_v40 }
  0x90   :  { %v248_v43 = vsel %vm240_vm4, %v676_v41, -inf  ;;  %v247_v44 = vsel %vm240_vm4, %v675_v42, -inf  ;;  %v283_v16 = vpop.permute.xlu0 %282  ;;  %v26_v41 = vld [vmem:[%s862_s4 + $0x10] sm:$0xf] }
  0x91   :  { %v251_v48 = vmax.f32 %v249_v23, %v247_v44  ;;  %v252_v49 = vmax.f32 %v250_v22, %v248_v43  ;;  %v287_v25 = vpop.permute.xlu1 %286 }
  0x93   :  { %v269_v60 = vrot.slane %v251_v48, 4  ;;  %v270_v61 = vrot.slane %v252_v49, 4 }
 0x159   :  { %v601_v46 = vpop.f32.mrb[0].mxu0  ;;  %v610_v47 = vpop.f32.mrb[0].mxu1 }
 0x15a   :  { %v149_v50 = vadd.f32 %v601_v46, %v66_v37  ;;  %v226_v51 = vadd.f32 %v610_v47, %v66_v37  ;;  %v143_v52 = vpop.f32.mrb[1].mxu0  ;;  %v220_v53 = vpop.f32.mrb[1].mxu1 }
 0x15b   :  { %v144_v54 = vadd.f32 %v143_v52, %v61_v45  ;;  %v221_v55 = vadd.f32 %v220_v53, %v61_v45 }
 0x15c   :  { %v230_v56 = vmax.f32 %v149_v50, 0.0  ;;  %v232_v57 = vmax.f32 %v226_v51, 0.0 }
 0x15d   :  { %v229_v58 = vmax.f32 %v144_v54, 0.0  ;;  %v231_v59 = vmax.f32 %v221_v55, 0.0 }
 0x15e   :  { %v258_v62 = vrot.slane %v230_v56, 4  ;;  %v261_v63 = vrot.slane %v232_v57, 4 }
 0x15f   :  { %v257_v0 = vrot.slane %v229_v58, 4  ;;  %549 = vst.msk [vmem:[%s863_s5] sm:$0xf] %vm548_vm5, %v229_v58  ;;  %v260_v1 = vrot.slane %v231_v59, 4  ;;  %550 = vst.msk [vmem:[%s863_s5 + $0x18] sm:$0xf] %vm548_vm5, %v231_v59 }
 0x160   :  { %v276_v2 = vsel %vm51_vm0, %v258_v62, %v269_v60  ;;  %v277_v3 = vsel %vm51_vm0, %v261_v63, %v270_v61 }
 0x161   :  { %v259_v4 = vsel %vm51_vm0, %v257_v0, %v258_v62  ;;  %v262_v5 = vsel %vm51_vm0, %v260_v1, %v261_v63 }
 0x162   :  { %v274_v6 = vsel %vm273_vm6, %v259_v4, %v258_v62  ;;  %v275_v7 = vsel %vm273_vm6, %v262_v5, %v261_v63 }
 0x163   :  { %v646_v8 = vpack.c.bf16 %v276_v2, %v274_v6  ;;  %v649_v9 = vpack.c.bf16 %v277_v3, %v275_v7 }
 0x165   :  { %647 = vmatpush3.bf16.msra.mxu0 %v646_v8  ;;  %650 = vmatpush3.bf16.msra.mxu1 %v649_v9 }
 0x168   :  { %616 = vmatmul.mubr.msk.f32.vlgmr.msra.gmra.mrb[2].mxu0 %vm294_vm7, %v278_v10  ;;  %629 = vmatmul.mubr.msk.f32.vlgmr.msra.gmra.mrb[2].mxu1 %vm294_vm7, %v278_v10 }
 0x169   :  { %618 = vmatprep.mubr.msk.f32.mxu0 %vm690_vm3, %v691_v35  ;;  %631 = vmatprep.mubr.msk.f32.mxu1 %vm690_vm3, %v691_v35 }
 0x16c   :  { %619 = vmatmul.mubr.msk.f32.gmra.mrb[4].mxu0 %vm294_vm7, %v279_v11  ;;  %632 = vmatmul.mubr.msk.f32.gmra.mrb[4].mxu1 %vm294_vm7, %v279_v11 }
 0x16d   :  { %621 = vmatprep.mubr.msk.f32.mxu0 %vm690_vm3, %v691_v35  ;;  %634 = vmatprep.mubr.msk.f32.mxu1 %vm690_vm3, %v691_v35 }
 0x170   :  { %622 = vmatmul.mubr.msk.f32.gmra.mrb[6].mxu0 %vm294_vm7, %v280_v13  ;;  %635 = vmatmul.mubr.msk.f32.gmra.mrb[6].mxu1 %vm294_vm7, %v280_v13 }
 0x23b   :  { %v370_v17 = vpop.f32.mrb[2].mxu0  ;;  %v450_v18 = vpop.f32.mrb[2].mxu1 }
 0x23c   :  { %v371_v19 = vadd.f32 %v370_v17, %v283_v16  ;;  %v451_v20 = vadd.f32 %v450_v18, %v283_v16  ;;  %v617_v21 = vpop.f32.mrb[3].mxu0  ;;  %v630_v22 = vpop.f32.mrb[3].mxu1 }
 0x23e   :  { %v802_v23 = vmax.f32 %v371_v19, 0.0  ;;  %v804_v24 = vmax.f32 %v451_v20, 0.0 }
 0x23f   :  { %v375_v26 = vpop.f32.mrb[4].mxu0  ;;  %v455_v27 = vpop.f32.mrb[4].mxu1 }
 0x240   :  { %v477_v28 = vsel %vm470_vm8, %v804_v24, 0.0  ;;  %v471_v29 = vsel %vm470_vm8, %v802_v23, 0.0  ;;  %v488_v30 = vmul.f32 %v802_v23, %v802_v23  ;;  %v633_v31 = vpop.f32.mrb[5].mxu1  ;;  %v620_v32 = vpop.f32.mrb[5].mxu0  ;;  %v376_v33 = vadd.f32 %v375_v26, %v287_v25 }
 0x241   :  { %478 = vadd.xlane.f32.xlu0 %v477_v28  ;;  %472 = vadd.xlane.f32.xlu1 %v471_v29  ;;  %v490_v35 = vmul.f32 %v804_v24, %v804_v24  ;;  %v456_v45 = vadd.f32 %v455_v27, %v287_v25 }
 0x242   :  { %v492_v34 = vsel %vm470_vm8, %v488_v30, 0.0  ;;  %v815_v36 = vmax.f32 %v376_v33, 0.0 }
 0x243   :  { %v498_v37 = vsel %vm470_vm8, %v490_v35, 0.0  ;;  %v460_v40 = vpop.f32.mrb[6].mxu1  ;;  %v380_v43 = vpop.f32.mrb[6].mxu0  ;;  %v468_v46 = vmax.f32 %v456_v45, 0.0 }
 0x244   :  { %v474_v38 = vsel %vm470_vm8, %v815_v36, 0.0  ;;  %v636_v42 = vpop.f32.mrb[7].mxu1  ;;  %v623_v44 = vpop.f32.mrb[7].mxu0  ;;  %v489_v48 = vmul.f32 %v815_v36, %v815_v36 }
 0x245   :  { %493 = vadd.xlane.f32.xlu0 %v492_v34  ;;  %v480_v47 = vsel %vm470_vm8, %v468_v46, 0.0  ;;  %v491_v50 = vmul.f32 %v468_v46, %v468_v46 }
 0x246   :  { %v495_v49 = vsel %vm470_vm8, %v489_v48, 0.0 }
 0x247   :  { %v501_v51 = vsel %vm470_vm8, %v491_v50, 0.0 }
 0x249   :  { %499 = vadd.xlane.f32.xlu0 %v498_v37 }
 0x24d   :  { %475 = vadd.xlane.f32.xlu0 %v474_v38 }
 0x252   :  { %525 = vperm.xlu1 %679, %v753_v14  }
 0x256   :  { %529 = vperm.xlu1 %679, %v747_v12  }
 0x25a   :  { %681 = vset.pattern.permute.xlu1 %v694_v39 }
 0x263   :  { %291 = vperm.xlu0 %677, %v26_v41  }
 0x267   :  { %680 = vset.pattern.permute.xlu0 %v694_v39 }
 0x268   :  { %537 = vperm.xlu0 %680, %v753_v14  }
 0x27a   :  { %481 = vadd.xlane.f32.xlu1 %v480_v47 }
 0x27e   :  { %496 = vadd.xlane.f32.xlu1 %v495_v49 }
 0x282   :  { %502 = vadd.xlane.f32.xlu1 %v501_v51 }
 0x293   :  { %541 = vperm.xlu1 %681, %v747_v12  }
 0x2ce   :  { %v479_v52 = vpop.xlane.xlu0 %478  ;;  %v473_v53 = vpop.xlane.xlu1 %472 }
 0x2cf   :  { %v483_v14 = vadd.f32 %v479_v52, %v473_v53 }
 0x2d1   :  { %v486_v55 = vmul.f32 0.0625, %v483_v14 }
 0x2d2   :  { %v494_v54 = vpop.xlane.xlu0 %493  ;;  %v526_v8 = vpop.permute.xlu1 %525 }
 0x2d3   :  { %v508_v59 = vmul.f32 %v486_v55, %v486_v55  ;;  %v516_v12 = vsub.f32 %v802_v23, %v486_v55  ;;  %v518_v4 = vsub.f32 %v804_v24, %v486_v55 }
 0x2d6   :  { %v500_v56 = vpop.xlane.xlu0 %499  ;;  %v530_v16 = vpop.permute.xlu1 %529 }
 0x2d7   :  { %v504_v57 = vadd.f32 %v500_v56, %v494_v54 }
 0x2d9   :  { %v506_v58 = vmul.f32 0.0625, %v504_v57 }
 0x2da   :  { %v476_v61 = vpop.xlane.xlu0 %475 }
 0x2db   :  { %v510_v60 = vsub.f32 %v506_v58, %v508_v59 }
 0x2dd   :  { %v512_v62 = vadd.f32 1e-05, %v510_v60 }
 0x2df   :  { %682 = vrsqrt.f32 %v512_v62 }
 0x2e2   :  { %v292_v63 = vpop.permute.xlu0 %291 }
 0x2e3   :  { %v461_v0 = vadd.f32 %v460_v40, %v292_v63  ;;  %v381_v1 = vadd.f32 %v380_v43, %v292_v63 }
 0x2e5   :  { %v469_v2 = vmax.f32 %v461_v0, 0.0  ;;  %v466_v3 = vmax.f32 %v381_v1, 0.0 }
 0x2e7   :  { %556 = vst.msk [vmem:[%s863_s5 + $0x2c] sm:$0xf] %vm548_vm5, %v469_v2  ;;  %555 = vst.msk [vmem:[%s863_s5 + $0x14] sm:$0xf] %vm548_vm5, %v466_v3  ;;  %v538_v9 = vpop.permute.xlu0 %537 }
 0x2e9   :  { %v683_v5 = vpop.eup %682 }
 0x2ea   :  { %v520_v6 = vmul.f32 %v683_v5, %v516_v12  ;;  %v522_v7 = vmul.f32 %v683_v5, %v518_v4 }
 0x2ec   :  { %v532_v10 = vmul.f32 %v526_v8, %v520_v6  ;;  %v534_v11 = vmul.f32 %v526_v8, %v522_v7 }
 0x2ee   :  { %v544_v13 = vadd.f32 %v538_v9, %v532_v10  ;;  %v546_v15 = vadd.f32 %v538_v9, %v534_v11 }
 0x2f0   :  { %551 = vst.msk [vmem:[%s863_s5 + $0x4] sm:$0xff] %vm470_vm8, %v544_v13  ;;  %553 = vst.msk [vmem:[%s863_s5 + $0x1c] sm:$0xff] %vm470_vm8, %v546_v15 }
 0x307   :  { %v482_v17 = vpop.xlane.xlu1 %481 }
 0x308   :  { %v484_v18 = vadd.f32 %v482_v17, %v476_v61 }
 0x30a   :  { %v487_v20 = vmul.f32 0.0625, %v484_v18 }
 0x30b   :  { %v497_v19 = vpop.xlane.xlu1 %496 }
 0x30c   :  { %v509_v24 = vmul.f32 %v487_v20, %v487_v20  ;;  %v517_v27 = vsub.f32 %v815_v36, %v487_v20  ;;  %v519_v28 = vsub.f32 %v468_v46, %v487_v20 }
 0x30f   :  { %v503_v21 = vpop.xlane.xlu1 %502 }
 0x310   :  { %v505_v22 = vadd.f32 %v503_v21, %v497_v19 }
 0x312   :  { %v507_v23 = vmul.f32 0.0625, %v505_v22 }
 0x313   :  { %v542_v32 = vpop.permute.xlu1 %541 }
 0x314   :  { %v511_v25 = vsub.f32 %v507_v23, %v509_v24 }
 0x316   :  { %v513_v26 = vadd.f32 1e-05, %v511_v25 }
 0x318   :  { %684 = vrsqrt.f32 %v513_v26 }
 0x322   :  { %v685_v29 = vpop.eup %684 }
 0x323   :  { %v521_v30 = vmul.f32 %v685_v29, %v517_v27  ;;  %v523_v31 = vmul.f32 %v685_v29, %v519_v28 }
 0x325   :  { %v533_v33 = vmul.f32 %v530_v16, %v521_v30  ;;  %v535_v34 = vmul.f32 %v530_v16, %v523_v31 }
 0x327   :  { %v545_v35 = vadd.f32 %v542_v32, %v533_v33  ;;  %v547_v37 = vadd.f32 %v542_v32, %v535_v34 }
 0x329   :  { %552 = vst.msk [vmem:[%s863_s5 + $0xc] sm:$0xff] %vm470_vm8, %v545_v35  ;;  %554 = vst.msk [vmem:[%s863_s5 + $0x24] sm:$0xff] %vm470_vm8, %v547_v37 }

</bundles_post_ra>
